<compile_context>
chip_gen: v5e
topology: v5e:2x2
jax: 0.10.0
libtpu: 0.0.40
codegen_flags: <defaults>
</compile_context>

<pallas_src>
import functools
import math

import jax
import jax.numpy as jnp
from jax import lax
from jax.experimental import pallas as pl
from jax.experimental.pallas import tpu as pltpu


# ----------------------------------------------------------------------------
# In-kernel helpers
# ----------------------------------------------------------------------------
def _erf_approx(x):
    # TODO(synk): lax.erf lowering on Mosaic is not guaranteed on all versions; use
    # Abramowitz & Stegun 7.1.26 (max abs err ~1.5e-7) so erf-GELU semantics of PyTorch's
    # activation='gelu' are preserved.  On v5e a tanh-GELU (EUP) may be cheaper.
    a1, a2, a3, a4, a5 = 0.254829592, -0.284496736, 1.421413741, -1.453152027, 1.061405429
    p = 0.3275911
    s = jnp.where(x >= 0.0, 1.0, -1.0)
    ax = jnp.abs(x)
    t = 1.0 / (1.0 + p * ax)
    poly = ((((a5 * t + a4) * t + a3) * t + a2) * t + a1) * t
    return s * (1.0 - poly * jnp.exp(-ax * ax))


def _gelu_exact(x):
    return 0.5 * x * (1.0 + _erf_approx(x * 0.7071067811865476))


def _ln(x, g, b, eps=1e-5):
    mu = jnp.mean(x, axis=-1, keepdims=True)
    var = jnp.mean((x - mu) * (x - mu), axis=-1, keepdims=True)
    return (x - mu) * lax.rsqrt(var + eps) * g + b


# ----------------------------------------------------------------------------
# Chip config / tiling / compiler-param helpers
# ----------------------------------------------------------------------------
@functools.lru_cache(maxsize=None)
def _chip_config():
    """(vmem_limit_cap, max_row_tile, min_parallel_blocks) from the physical VMEM size."""
    phys = 128 << 20
    try:
        info = pltpu.get_tpu_info()
        phys = int(getattr(info, "vmem_capacity_bytes", phys))
    except Exception:
        pass
    big_vmem = phys >= (96 << 20)          # v5e / v6e (128 MiB) vs v7x (64 MiB)
    cap = min(max(phys - (16 << 20), 32 << 20), 100 << 20)
    max_tile = 512 if big_vmem else 256
    min_blocks = 1 if big_vmem else 2      # v7x has 2 TCs: give each >=1 parallel block
    return cap, max_tile, min_blocks


def _mosaic_params(est_bytes, semantics):
    cap, _, _ = _chip_config()
    limit = int(min(cap, max(32 << 20, 2 * int(est_bytes) + (2 << 20))))
    return pltpu.CompilerParams(dimension_semantics=semantics, vmem_limit_bytes=limit)


def _row_tiling(n, max_tile, min_blocks=1):
    """Row tile size + padded row count minimizing padding waste."""
    nblocks = max(min_blocks, -(-n // max_tile))
    if nblocks <= 1:
        return n, n                        # single full block (always legal)
    tile = -(-n // nblocks)
    tile = max(8, ((tile + 7) // 8) * 8)   # tile < full dim must be a multiple of 8
    npad = -(-n // tile) * tile
    return tile, npad


@functools.lru_cache(maxsize=None)
def _buffered_ok():
    """Probe whether pipeline_mode=pl.Buffered(1) is accepted (constant, varying & 3-D maps)."""
    if not hasattr(pl, "Buffered"):
        return False
    try:
        def probe(x_ref, c_ref, d_ref, o_ref):
            o_ref[...] = x_ref[...] + c_ref[...] + d_ref[0]

        x = jnp.zeros((16, 128), jnp.float32)
        c = jnp.zeros((8, 128), jnp.float32)
        d = jnp.zeros((2, 8, 128), jnp.float32)
        f = pl.pallas_call(
            probe,
            out_shape=jax.ShapeDtypeStruct((16, 128), jnp.float32),
            grid=(2,),
            in_specs=[
                pl.BlockSpec((8, 128), lambda i: (i, 0), pipeline_mode=pl.Buffered(1)),
                pl.BlockSpec((8, 128), lambda i: (0, 0), pipeline_mode=pl.Buffered(1)),
                pl.BlockSpec((1, 8, 128), lambda i: (i, 0, 0), pipeline_mode=pl.Buffered(1)),
            ],
            out_specs=pl.BlockSpec((8, 128), lambda i: (i, 0)))
        jax.block_until_ready(f(x, c, d))
        return True
    except Exception:
        return False


def _const_spec(block_shape, index_map):
    """BlockSpec for operands whose block (almost) never changes: single-buffered if possible."""
    if _buffered_ok():
        return pl.BlockSpec(block_shape, index_map, pipeline_mode=pl.Buffered(1))
    return pl.BlockSpec(block_shape, index_map)


# ----------------------------------------------------------------------------
# Fused (LayerNorm?) -> Linear -> (GELU?) -> (Linear?) -> (RMS?) -> (+res?) -> (LayerNorm?)
# ----------------------------------------------------------------------------
def _fused_linear_kernel(*refs, has_pre_ln, has_w2, res_mode, has_post_ln,
                         act_mid, rms_norm, compute_dtype):
    # res_mode: 0 = none, 1 = separate residual ref, 2 = residual is the kernel input x.
    it = iter(refs)
    x_ref = next(it)
    if has_pre_ln:
        pg_ref, pb_ref = next(it), next(it)
    w1_ref, b1_ref = next(it), next(it)
    if has_w2:
        w2_ref, b2_ref = next(it), next(it)
    if res_mode == 1:
        r_ref = next(it)
    if has_post_ln:
        qg_ref, qb_ref = next(it), next(it)
    o_ref = next(it)

    x_raw = x_ref[...]
    x = x_raw.astype(jnp.float32)
    if has_pre_ln:
        mm_in = _ln(x, pg_ref[...].astype(jnp.float32),
                    pb_ref[...].astype(jnp.float32)).astype(compute_dtype)
    else:
        mm_in = x_raw.astype(compute_dtype)
    y = jnp.dot(mm_in, w1_ref[...].astype(compute_dtype),
                preferred_element_type=jnp.float32) + b1_ref[...].astype(jnp.float32)
    if act_mid == "gelu":
        y = _gelu_exact(y)
    if has_w2:
        y = jnp.dot(y.astype(compute_dtype), w2_ref[...].astype(compute_dtype),
                    preferred_element_type=jnp.float32) + b2_ref[...].astype(jnp.float32)
    if rms_norm:  # x / sqrt(mean(x**2, -1)) -- no eps, as in the reference model
        y = y * lax.rsqrt(jnp.mean(y * y, axis=-1, keepdims=True))
    if res_mode == 1:
        y = y + r_ref[...].astype(jnp.float32)
    elif res_mode == 2:
        y = y + x
    if has_post_ln:
        y = _ln(y, qg_ref[...].astype(jnp.float32), qb_ref[...].astype(jnp.float32))
    o_ref[...] = y.astype(o_ref.dtype)


def fused_linear(x, w1, b1, *, w2=None, b2=None, pre_ln=None, post_ln=None,
                 act_mid="none", rms_norm=False, residual=None, residual_is_input=False,
                 compute_dtype=jnp.bfloat16, out_dtype=None, max_tile=None):
    """Single-kernel fusion of (LN) + linear + (gelu) + (linear) + (RMS) + (residual) + (LN)."""
    _, chip_tile, min_blocks = _chip_config()
    if max_tile is None:
        max_tile = chip_tile
    out_dtype = out_dtype if out_dtype is not None else x.dtype

    N, Din = x.shape
    Dmid = w1.shape[1]
    Dout = w2.shape[1] if w2 is not None else Dmid
    if residual_is_input:
        assert Dout == Din
    tile, Np = _row_tiling(N, max_tile, min_blocks)
    if Np != N:
        x = jnp.pad(x, ((0, Np - N), (0, 0)))
        if residual is not None and not residual_is_input:
            residual = jnp.pad(residual, ((0, Np - N), (0, 0)))

    args = [x]
    specs = [pl.BlockSpec((tile, Din), lambda i: (i, 0))]
    if pre_ln is not None:
        g, b = pre_ln
        args += [g.reshape(1, Din), b.reshape(1, Din)]
        specs += [_const_spec((1, Din), lambda i: (0, 0)),
                  _const_spec((1, Din), lambda i: (0, 0))]
    args += [w1, b1.reshape(1, Dmid)]
    specs += [_const_spec((Din, Dmid), lambda i: (0, 0)),
              _const_spec((1, Dmid), lambda i: (0, 0))]
    if w2 is not None:
        args += [w2, b2.reshape(1, Dout)]
        specs += [_const_spec((Dmid, Dout), lambda i: (0, 0)),
                  _const_spec((1, Dout), lambda i: (0, 0))]
    if residual is not None and not residual_is_input:
        args += [residual]
        specs += [pl.BlockSpec((tile, Dout), lambda i: (i, 0))]
    if post_ln is not None:
        g, b = post_ln
        args += [g.reshape(1, Dout), b.reshape(1, Dout)]
        specs += [_const_spec((1, Dout), lambda i: (0, 0)),
                  _const_spec((1, Dout), lambda i: (0, 0))]

    res_mode = 2 if residual_is_input else (1 if residual is not None else 0)
    kern = functools.partial(
        _fused_linear_kernel,
        has_pre_ln=pre_ln is not None, has_w2=w2 is not None,
        res_mode=res_mode, has_post_ln=post_ln is not None,
        act_mid=act_mid, rms_norm=rms_norm, compute_dtype=compute_dtype)

    bx = jnp.dtype(x.dtype).itemsize
    bw = jnp.dtype(w1.dtype).itemsize
    bo = jnp.dtype(out_dtype).itemsize
    est = (2 * tile * Din * bx + 2 * tile * Dout * bo + 4 * tile * max(Dmid, Dout)
           + Din * Dmid * bw + (Dmid * Dout * bw if w2 is not None else 0)
           + (2 * tile * Dout * bx if res_mode == 1 else 0)
           + 8 * (Din + Dmid + Dout))
    out = pl.pallas_call(
        kern,
        out_shape=jax.ShapeDtypeStruct((Np, Dout), out_dtype),
        grid=(Np // tile,),
        in_specs=specs,
        out_specs=pl.BlockSpec((tile, Dout), lambda i: (i, 0)),
        compiler_params=_mosaic_params(est, ("parallel",)),
    )(*args)
    return out[:N] if Np != N else out


# ----------------------------------------------------------------------------
# Fused (LayerNorm?) + single (E, 3E) QKV GEMM -> three lane-dense (N, E) outputs
# ----------------------------------------------------------------------------
def _qkv_kernel(*refs, has_ln, compute_dtype, E):
    it = iter(refs)
    x_ref = next(it)
    if has_ln:
        g_ref, b_ref = next(it), next(it)
    w_ref, bqkv_ref = next(it), next(it)
    q_ref, k_ref, v_ref = next(it), next(it), next(it)

    x_raw = x_ref[...]
    if has_ln:
        mm_in = _ln(x_raw.astype(jnp.float32), g_ref[...].astype(jnp.float32),
                    b_ref[...].astype(jnp.float32)).astype(compute_dtype)
    else:
        mm_in = x_raw.astype(compute_dtype)
    y = jnp.dot(mm_in, w_ref[...].astype(compute_dtype),
                preferred_element_type=jnp.float32) + bqkv_ref[...].astype(jnp.float32)
    q_ref[...] = y[:, :E].astype(q_ref.dtype)
    k_ref[...] = y[:, E:2 * E].astype(k_ref.dtype)
    v_ref[...] = y[:, 2 * E:].astype(v_ref.dtype)


def qkv_proj(x, w_qkv, b_qkv, *, pre_ln=None, compute_dtype=jnp.bfloat16, max_tile=None):
    N, E = x.shape
    assert w_qkv.shape == (E, 3 * E)
    _, chip_tile, min_blocks = _chip_config()
    if max_tile is None:
        max_tile = chip_tile
    tile, Np = _row_tiling(N, max_tile, min_blocks)
    if Np != N:
        x = jnp.pad(x, ((0, Np - N), (0, 0)))

    args = [x]
    specs = [pl.BlockSpec((tile, E), lambda i: (i, 0))]
    if pre_ln is not None:
        g, b = pre_ln
        args += [g.reshape(1, E), b.reshape(1, E)]
        specs += [_const_spec((1, E), lambda i: (0, 0)),
                  _const_spec((1, E), lambda i: (0, 0))]
    args += [w_qkv, b_qkv.reshape(1, 3 * E)]
    specs += [_const_spec((E, 3 * E), lambda i: (0, 0)),
              _const_spec((1, 3 * E), lambda i: (0, 0))]

    kern = functools.partial(_qkv_kernel, has_ln=pre_ln is not None,
                             compute_dtype=compute_dtype, E=E)
    bx = jnp.dtype(x.dtype).itemsize
    bw = jnp.dtype(w_qkv.dtype).itemsize
    est = 2 * tile * E * bx + 3 * E * E * bw + 6 * tile * E * bx + 4 * tile * 3 * E + 16 * E
    q, k, v = pl.pallas_call(
        kern,
        out_shape=tuple(jax.ShapeDtypeStruct((Np, E), x.dtype) for _ in range(3)),
        grid=(Np // tile,),
        in_specs=specs,
        out_specs=tuple(pl.BlockSpec((tile, E), lambda i: (i, 0)) for _ in range(3)),
        compiler_params=_mosaic_params(est, ("parallel",)),
    )(*args)
    if Np != N:
        q, k, v = q[:N], k[:N], v[:N]
    return q, k, v


# ----------------------------------------------------------------------------
# Multi-head attention: lane-dense over E, context-only K/V, f32 softmax, bf16 MXU
# ----------------------------------------------------------------------------
def _attn_kernel(q_ref, k_ref, v_ref, o_ref, *, nhead, eval_pos, n_keys, scale, compute_dtype):
    q = q_ref[0]                               # (tq, E)
    k = k_ref[0]                               # (n_keys, E) -- context rows only
    v = v_ref[0]
    E = q.shape[-1]
    Dh = E // nhead
    need_mask = n_keys > eval_pos              # only the padded tail of the key block
    if need_mask:
        neg = jnp.where(lax.broadcasted_iota(jnp.int32, (1, n_keys), 1) >= eval_pos,
                        jnp.float32(-1e30), jnp.float32(0.0))
    per_head_store = (Dh % 128 == 0)
    outs = []
    for h in range(nhead):
        lo = h * Dh
        # fold 1/sqrt(Dh) into the (tq, Dh) query tile instead of the (tq, n_keys) scores
        qh = (q[:, lo:lo + Dh].astype(jnp.float32) * scale).astype(compute_dtype)
        kh = k[:, lo:lo + Dh].astype(compute_dtype)
        vh = v[:, lo:lo + Dh].astype(compute_dtype)
        s = lax.dot_general(qh, kh, (((1,), (1,)), ((), ())),
                            preferred_element_type=jnp.float32)   # f32 scores
        if need_mask:
            s = s + neg
        m = jnp.max(s, axis=-1, keepdims=True)
        p = jnp.exp(s - m)
        p = p * pl.reciprocal(jnp.sum(p, axis=-1, keepdims=True), approx=True)
        oh = jnp.dot(p.astype(compute_dtype), vh, preferred_element_type=jnp.float32)
        if per_head_store:
            o_ref[0, :, lo:lo + Dh] = oh.astype(o_ref.dtype)
        else:
            outs.append(oh)
    if not per_head_store:
        o_ref[0] = jnp.concatenate(outs, axis=-1).astype(o_ref.dtype)


def attention(q, k, v, *, nhead, eval_pos, compute_dtype=jnp.bfloat16, max_q_tile=None):
    """q,k,v: (B, S, E). Returns (B, S, E). All queries attend only to keys < eval_pos."""
    # TODO(synk): for very long eval_pos the per-head (tq, Sk) scores + full (Sk, E) K/V blocks
    # should switch to a KV-tiled online-softmax (flash) variant (3rd grid axis, "arbitrary"),
    # and QKV-projection + attention could be fused per (batch, q-tile) via pltpu.emit_pipeline
    # to avoid the q/k/v HBM round-trip entirely.
    B, S, E = q.shape
    Dh = E // nhead
    _, chip_tile, _ = _chip_config()
    if max_q_tile is None:
        max_q_tile = chip_tile

    # context-only keys/values: slice to round_up(eval_pos, 8) rows (tail masked in-kernel)
    Sk = min(((eval_pos + 7) // 8) * 8, S)
    k = k[:, :Sk]
    v = v[:, :Sk]

    tq, Sp = _row_tiling(S, max_q_tile, 1)
    if Sp != S:
        q = jnp.pad(q, ((0, 0), (0, Sp - S), (0, 0)))
    kern = functools.partial(_attn_kernel, nhead=nhead, eval_pos=eval_pos, n_keys=Sk,
                             scale=1.0 / math.sqrt(Dh), compute_dtype=compute_dtype)
    bpe = jnp.dtype(q.dtype).itemsize
    est = (2 * tq * E * bpe + 2 * 2 * Sk * E * bpe + 2 * tq * E * bpe
           + 8 * tq * Sk + 8 * tq * Dh + 4 * Sk)
    out = pl.pallas_call(
        kern,
        out_shape=jax.ShapeDtypeStruct((B, Sp, E), q.dtype),
        grid=(B, Sp // tq),
        in_specs=[pl.BlockSpec((1, tq, E), lambda b, i: (b, i, 0)),
                  _const_spec((1, Sk, E), lambda b, i: (b, 0, 0)),
                  _const_spec((1, Sk, E), lambda b, i: (b, 0, 0))],
        out_specs=pl.BlockSpec((1, tq, E), lambda b, i: (b, i, 0)),
        compiler_params=_mosaic_params(est, ("parallel", "parallel")),
    )(q, k, v)
    return out[:, :S] if Sp != S else out


# ----------------------------------------------------------------------------
# Transformer encoder layer (PyTorch nn.TransformerEncoderLayer semantics, dropout=0)
# ----------------------------------------------------------------------------
def encoder_layer(src, lp, *, nhead, norm_first, eval_pos, compute_dtype):
    B, S, E = src.shape
    x_flat = src.reshape(B * S, E)

    pre = (lp["ln1_g"], lp["ln1_b"]) if norm_first else None
    q, k, v = qkv_proj(x_flat, lp["w_qkv"], lp["b_qkv"], pre_ln=pre,
                       compute_dtype=compute_dtype)
    a = attention(q.reshape(B, S, E), k.reshape(B, S, E), v.reshape(B, S, E),
                  nhead=nhead, eval_pos=eval_pos, compute_dtype=compute_dtype)
    a_flat = a.reshape(B * S, E)

    if norm_first:
        # x = src + out_proj(attn); out = x + FF(LN2(x))
        x = fused_linear(a_flat, lp["out_w"], lp["out_b"], residual=x_flat,
                         compute_dtype=compute_dtype)
        y = fused_linear(x, lp["ff1_w"], lp["ff1_b"], w2=lp["ff2_w"], b2=lp["ff2_b"],
                         pre_ln=(lp["ln2_g"], lp["ln2_b"]), act_mid="gelu",
                         residual_is_input=True, compute_dtype=compute_dtype)
    else:
        # x = LN1(src + out_proj(attn)); out = LN2(x + FF(x))
        x = fused_linear(a_flat, lp["out_w"], lp["out_b"], residual=x_flat,
                         post_ln=(lp["ln1_g"], lp["ln1_b"]), compute_dtype=compute_dtype)
        y = fused_linear(x, lp["ff1_w"], lp["ff1_b"], w2=lp["ff2_w"], b2=lp["ff2_b"],
                         act_mid="gelu", residual_is_input=True,
                         post_ln=(lp["ln2_g"], lp["ln2_b"]), compute_dtype=compute_dtype)
    return y.reshape(B, S, E)


# ----------------------------------------------------------------------------
# Preprocessing glue (nan-aware normalization / outlier clipping), plain JAX
# ----------------------------------------------------------------------------
def _nanmean(x, axis):
    m = ~jnp.isnan(x)
    num = jnp.sum(m, axis=axis, keepdims=True).astype(jnp.float32)
    return jnp.sum(jnp.where(m, x, 0.0), axis=axis, keepdims=True) / num


def _nanstd(x, axis):
    m = ~jnp.isnan(x)
    num = jnp.sum(m, axis=axis, keepdims=True).astype(jnp.float32)
    mean = jnp.sum(jnp.where(m, x, 0.0), axis=axis, keepdims=True) / num
    sq = jnp.where(m, (x - mean) ** 2, 0.0)
    return jnp.sqrt(jnp.sum(sq, axis=axis, keepdims=True) / (num - 1.0))


def normalize_data(x, pos):
    d = x[:pos]
    mean = _nanmean(d, 0)
    std = _nanstd(d, 0) + 1e-6
    x = (x - mean) / std
    return jnp.clip(x, -100.0, 100.0)


def clip_outliers(x, pos, n_sigma=10):
    d = x[:pos]
    mean, std = _nanmean(d, 0), _nanstd(d, 0)
    lower, upper = mean - std * n_sigma, mean + std * n_sigma
    d2 = jnp.where((d > upper) | (d < lower), jnp.nan, d)
    mean, std = _nanmean(d2, 0), _nanstd(d2, 0)
    lower, upper = mean - std * n_sigma, mean + std * n_sigma
    x = jnp.maximum(-jnp.log(1.0 + jnp.abs(x)) + lower, x)
    x = jnp.minimum(jnp.log(1.0 + jnp.abs(x)) + upper, x)
    return x


# ----------------------------------------------------------------------------
# Parameter preparation: bf16 storage + fused QKV weight
# ----------------------------------------------------------------------------
def _prepare_params(params, dtype):
    c = lambda a: a.astype(dtype)
    layers = []
    for lp in params["layers"]:
        layers.append(dict(
            w_qkv=c(jnp.concatenate([lp["wq"], lp["wk"], lp["wv"]], axis=1)),
            b_qkv=c(jnp.concatenate([lp["bq"], lp["bk"], lp["bv"]], axis=0)),
            out_w=c(lp["out_w"]), out_b=c(lp["out_b"]),
            ff1_w=c(lp["ff1_w"]), ff1_b=c(lp["ff1_b"]),
            ff2_w=c(lp["ff2_w"]), ff2_b=c(lp["ff2_b"]),
            ln1_g=c(lp["ln1_g"]), ln1_b=c(lp["ln1_b"]),
            ln2_g=c(lp["ln2_g"]), ln2_b=c(lp["ln2_b"])))
    return dict(
        enc_w=c(params["enc_w"]), enc_b=c(params["enc_b"]),
        layers=layers,
        cls_head={k: c(v) for k, v in params["cls_head"].items()},
        reg_head={k: c(v) for k, v in params["reg_head"].items()})


# ----------------------------------------------------------------------------
# Full TabDPTModel.forward
# ----------------------------------------------------------------------------
def tabdpt_forward(params, x_src, y_src, task, *, nhead, norm_first,
                   compute_dtype=jnp.bfloat16, storage_dtype=jnp.bfloat16):
    S, B, F = x_src.shape
    eval_pos = y_src.shape[0]
    E = params["enc_w"].shape[1]
    p = _prepare_params(params, storage_dtype)

    x = normalize_data(x_src, eval_pos)
    x = clip_outliers(x, eval_pos, n_sigma=10)
    x = jnp.nan_to_num(x, nan=0.0)

    # one layout change: seq-first (S,B,F) -> batch-first (B,S,F); all kernels then operate
    # on contiguous (B*S, *) slabs with no further transposes.
    xb = jnp.transpose(x, (1, 0, 2)).astype(storage_dtype)
    xe = fused_linear(xb.reshape(B * S, F), p["enc_w"], p["enc_b"], rms_norm=True,
                      compute_dtype=compute_dtype, out_dtype=storage_dtype).reshape(B, S, E)

    # y encoder: degenerate Din=1 GEMV (outer product) -- plain JAX.
    yb = jnp.transpose(y_src, (1, 0))                               # (B, eval_pos)
    ye = (yb[:, :, None].astype(jnp.float32) * params["yenc_w"].reshape(1, 1, E)
          + params["yenc_b"].reshape(1, 1, E))

    src = jnp.concatenate([xe[:, :eval_pos].astype(jnp.float32) + ye,
                           xe[:, eval_pos:].astype(jnp.float32)], axis=1)
    src = src.astype(storage_dtype)                                  # (B, S, E)

    for lp in p["layers"]:
        src = encoder_layer(src, lp, nhead=nhead, norm_first=norm_first,
                            eval_pos=eval_pos, compute_dtype=compute_dtype)

    # prediction head: only query rows matter (pred[eval_pos:]); pad the tiny output dim to a
    # lane-dense 128 columns, slice back in the wrapper.
    head = p["cls_head"] if task == "cls" else p["reg_head"]
    n_out = head["w2"].shape[1]
    dpad = ((n_out + 127) // 128) * 128
    w2p = jnp.pad(head["w2"], ((0, 0), (0, dpad - n_out))) if dpad != n_out else head["w2"]
    b2p = jnp.pad(head["b2"], (0, dpad - n_out)) if dpad != n_out else head["b2"]

    Sq = S - eval_pos
    hq = src[:, eval_pos:, :].reshape(B * Sq, E)
    pred = fused_linear(hq, head["w1"], head["b1"], w2=w2p, b2=b2p, act_mid="gelu",
                        compute_dtype=compute_dtype, out_dtype=jnp.float32)[:, :n_out]
    return pred.reshape(B, Sq, n_out).transpose(1, 0, 2)            # (Sq, B, n_out)


# ----------------------------------------------------------------------------
# Deterministic parameter initialization (PyTorch-default-like uniform bounds)
# ----------------------------------------------------------------------------
def init_params(key, num_features, ninp, nhid, nhead, nlayers, n_out):
    keys = iter(jax.random.split(key, 2 * (2 + 4 * nlayers + 4)))

    def lin(din, dout):
        bound = 1.0 / math.sqrt(din)
        w = jax.random.uniform(next(keys), (din, dout), jnp.float32, -bound, bound)
        b = jax.random.uniform(next(keys), (dout,), jnp.float32, -bound, bound)
        return w, b

    enc_w, enc_b = lin(num_features, ninp)
    yenc_w, yenc_b = lin(1, ninp)
    layers = []
    for _ in range(nlayers):
        in_w, in_b = lin(ninp, 3 * ninp)
        out_w, out_b = lin(ninp, ninp)
        ff1_w, ff1_b = lin(ninp, nhid)
        ff2_w, ff2_b = lin(nhid, ninp)
        layers.append(dict(
            wq=in_w[:, :ninp], wk=in_w[:, ninp:2 * ninp], wv=in_w[:, 2 * ninp:],
            bq=in_b[:ninp], bk=in_b[ninp:2 * ninp], bv=in_b[2 * ninp:],
            out_w=out_w, out_b=out_b,
            ff1_w=ff1_w, ff1_b=ff1_b, ff2_w=ff2_w, ff2_b=ff2_b,
            ln1_g=jnp.ones((ninp,), jnp.float32), ln1_b=jnp.zeros((ninp,), jnp.float32),
            ln2_g=jnp.ones((ninp,), jnp.float32), ln2_b=jnp.zeros((ninp,), jnp.float32)))
    ch1_w, ch1_b = lin(ninp, nhid)
    ch2_w, ch2_b = lin(nhid, n_out)
    rh1_w, rh1_b = lin(ninp, nhid)
    rh2_w, rh2_b = lin(nhid, 1)
    return dict(
        enc_w=enc_w, enc_b=enc_b, yenc_w=yenc_w, yenc_b=yenc_b, layers=layers,
        cls_head=dict(w1=ch1_w, b1=ch1_b, w2=ch2_w, b2=ch2_b),
        reg_head=dict(w1=rh1_w, b1=rh1_b, w2=rh2_w, b2=rh2_b))


# ----------------------------------------------------------------------------
# Pure-JAX reference (seq-first, mirrors the PyTorch module) for a correctness check
# ----------------------------------------------------------------------------
def _ref_mha(x, lp, col_mask, nhead):
    S, B, E = x.shape
    Dh = E // nhead
    q = x @ lp["wq"] + lp["bq"]
    k = x @ lp["wk"] + lp["bk"]
    v = x @ lp["wv"] + lp["bv"]

    def heads(t):
        return t.reshape(S, B, nhead, Dh).transpose(1, 2, 0, 3)     # (B, H, S, Dh)

    q, k, v = heads(q), heads(k), heads(v)
    s = jnp.einsum("bhqd,bhkd->bhqk", q, k) / math.sqrt(Dh)
    s = jnp.where(col_mask[None, None, None, :], -jnp.inf, s)
    p = jax.nn.softmax(s, axis=-1)
    o = jnp.einsum("bhqk,bhkd->bhqd", p, v).transpose(2, 0, 1, 3).reshape(S, B, E)
    return o @ lp["out_w"] + lp["out_b"]


def _ref_layer(x, lp, col_mask, nhead, norm_first):
    def ln(t, g, b):
        mu = t.mean(-1, keepdims=True)
        var = ((t - mu) ** 2).mean(-1, keepdims=True)
        return (t - mu) / jnp.sqrt(var + 1e-5) * g + b

    def ffn(t):
        h = jax.nn.gelu(t @ lp["ff1_w"] + lp["ff1_b"], approximate=False)
        return h @ lp["ff2_w"] + lp["ff2_b"]

    if norm_first:
        x = x + _ref_mha(ln(x, lp["ln1_g"], lp["ln1_b"]), lp, col_mask, nhead)
        x = x + ffn(ln(x, lp["ln2_g"], lp["ln2_b"]))
    else:
        x = ln(x + _ref_mha(x, lp, col_mask, nhead), lp["ln1_g"], lp["ln1_b"])
        x = ln(x + ffn(x), lp["ln2_g"], lp["ln2_b"])
    return x


def _reference_forward(params, x_src, y_src, task, *, nhead, norm_first):
    S, B, F = x_src.shape
    eval_pos = y_src.shape[0]
    x = normalize_data(x_src, eval_pos)
    x = clip_outliers(x, eval_pos, n_sigma=10)
    x = jnp.nan_to_num(x, nan=0.0)
    xe = x @ params["enc_w"] + params["enc_b"]
    xe = xe / jnp.sqrt(jnp.mean(xe * xe, axis=-1, keepdims=True))
    ye = y_src[..., None] * params["yenc_w"][0] + params["yenc_b"]
    src = jnp.concatenate([xe[:eval_pos] + ye, xe[eval_pos:]], axis=0)
    col_mask = jnp.arange(S) >= eval_pos
    for lp in params["layers"]:
        src = _ref_layer(src, lp, col_mask, nhead, norm_first)
    head = params["cls_head"] if task == "cls" else params["reg_head"]
    h = jax.nn.gelu(src @ head["w1"] + head["b1"], approximate=False)
    pred = h @ head["w2"] + head["b2"]
    return pred[eval_pos:]


# ----------------------------------------------------------------------------
if __name__ == "__main__":
    # Small but representative config: ninp=32, nhead=4, nhid=64, nlayers=2,
    # num_features=12, n_out=4; sequence S=16 with eval_pos=8 context rows, batch B=2.
    S, B, eval_pos = 16, 2, 8
    num_features, ninp, nhead, nhid, nlayers, n_out = 12, 32, 4, 64, 2, 4

    key = jax.random.PRNGKey(0)
    kx, ky, kp = jax.random.split(key, 3)
    x_src = jax.random.normal(kx, (S, B, num_features), jnp.float32) * 2.0 + 0.5
    x_src = x_src.at[0, 0, 0].set(jnp.nan)  # exercise nan-aware preprocessing path
    y_src = jax.random.randint(ky, (eval_pos, B), 0, n_out).astype(jnp.float32)

    params = init_params(kp, num_features, ninp, nhid, nhead, nlayers, n_out)

    for norm_first in (True, False):
        out = tabdpt_forward(params, x_src, y_src, "cls",
                             nhead=nhead, norm_first=norm_first)
        out = jax.block_until_ready(out)
        assert out.shape == (S - eval_pos, B, n_out), out.shape
        assert bool(jnp.all(jnp.isfinite(out)))

        with jax.default_matmul_precision("float32"):
            ref = _reference_forward(params, x_src, y_src, "cls",
                                     nhead=nhead, norm_first=norm_first)
        ref = jax.block_until_ready(ref)
        diff = float(jnp.max(jnp.abs(out - ref)))
        scale = 1.0 + float(jnp.max(jnp.abs(ref)))
        assert diff <= 0.1 * scale, (norm_first, diff, scale)

    print("KERNEL_OK")
</pallas_src>

<mosaic_0001>
module attributes {stable_mosaic.version = 11 : i64} {
  func.func @probe(%arg0: i32, %arg1: memref<8x128xf32, #tpu.memory_space<vmem>>, %arg2: memref<8x128xf32, #tpu.memory_space<vmem>>, %arg3: memref<1x8x128xf32, #tpu.memory_space<vmem>>, %arg4: memref<8x128xf32, #tpu.memory_space<vmem>>) attributes {dimension_semantics = [#tpu.dimension_semantics<arbitrary>], iteration_bounds = array<i64: 2>, scalar_prefetch = 0 : i64, scratch_operands = 0 : i64, tpu.core_type = #tpu.core_type<tc>, window_params = [{pipeline_mode = #tpu.pipeline_mode<synchronous>, transform_indices = @transform_0, window_bounds = array<i64: 8, 128>}, {pipeline_mode = #tpu.pipeline_mode<synchronous>, transform_indices = @transform_1, window_bounds = array<i64: 8, 128>}, {pipeline_mode = #tpu.pipeline_mode<synchronous>, transform_indices = @transform_2, window_bounds = array<i64: 1, 8, 128>}, {transform_indices = @transform_3, window_bounds = array<i64: 8, 128>}]} {
    %c0 = arith.constant 0 : index
    %c0_0 = arith.constant 0 : index
    %0 = vector.load %arg1[%c0, %c0_0] : memref<8x128xf32, #tpu.memory_space<vmem>>, vector<8x128xf32>
    %c0_1 = arith.constant 0 : index
    %c0_2 = arith.constant 0 : index
    %1 = vector.load %arg2[%c0_1, %c0_2] : memref<8x128xf32, #tpu.memory_space<vmem>>, vector<8x128xf32>
    %2 = arith.addf %0, %1 : vector<8x128xf32>
    %c0_3 = arith.constant 0 : index
    %c0_4 = arith.constant 0 : index
    %c0_5 = arith.constant 0 : index
    %3 = vector.load %arg3[%c0_3, %c0_4, %c0_5] : memref<1x8x128xf32, #tpu.memory_space<vmem>>, vector<1x8x128xf32>
    %4 = vector.shape_cast %3 : vector<1x8x128xf32> to vector<8x128xf32>
    %5 = arith.addf %2, %4 : vector<8x128xf32>
    %c0_6 = arith.constant 0 : index
    %c0_7 = arith.constant 0 : index
    %6 = vector.load %arg4[%c0_6, %c0_7] : memref<8x128xf32, #tpu.memory_space<vmem>>, vector<8x128xf32>
    tpu.vector_store %arg4[%c0_6, %c0_7], %5 {strides = array<i32>} : memref<8x128xf32, #tpu.memory_space<vmem>>, vector<8x128xf32>,
    return
  }
  func.func @transform_0(%arg0: i32) -> (i32, i32) {
    %c0_i32 = arith.constant 0 : i32
    %c0_i32_0 = arith.constant 0 : i32
    return %arg0, %c0_i32 : i32, i32
  }
  func.func @transform_1(%arg0: i32) -> (i32, i32) {
    %c0_i32 = arith.constant 0 : i32
    %c0_i32_0 = arith.constant 0 : i32
    %c0_i32_1 = arith.constant 0 : i32
    return %c0_i32, %c0_i32_0 : i32, i32
  }
  func.func @transform_2(%arg0: i32) -> (i32, i32, i32) {
    %c0_i32 = arith.constant 0 : i32
    %c0_i32_0 = arith.constant 0 : i32
    %c0_i32_1 = arith.constant 0 : i32
    return %arg0, %c0_i32, %c0_i32_0 : i32, i32, i32
  }
  func.func @transform_3(%arg0: i32) -> (i32, i32) {
    %c0_i32 = arith.constant 0 : i32
    %c0_i32_0 = arith.constant 0 : i32
    return %arg0, %c0_i32 : i32, i32
  }
}

module attributes {stable_mosaic.version = 11 : i64} {
  func.func @_fused_linear_kernel(%arg0: i32, %arg1: memref<32x12xbf16, #tpu.memory_space<vmem>>, %arg2: memref<12x32xbf16, #tpu.memory_space<vmem>>, %arg3: memref<1x32xbf16, #tpu.memory_space<vmem>>, %arg4: memref<32x32xbf16, #tpu.memory_space<vmem>>) attributes {dimension_semantics = [#tpu.dimension_semantics<parallel>], iteration_bounds = array<i64: 1>, scalar_prefetch = 0 : i64, scratch_operands = 0 : i64, tpu.core_type = #tpu.core_type<tc>, window_params = [{transform_indices = @transform_0, window_bounds = array<i64: 32, 12>}, {pipeline_mode = #tpu.pipeline_mode<synchronous>, transform_indices = @transform_1, window_bounds = array<i64: 12, 32>}, {pipeline_mode = #tpu.pipeline_mode<synchronous>, transform_indices = @transform_2, window_bounds = array<i64: 1, 32>}, {transform_indices = @transform_3, window_bounds = array<i64: 32, 32>}]} {
    %c0 = arith.constant 0 : index
    %c0_0 = arith.constant 0 : index
    %0 = vector.load %arg1[%c0, %c0_0] : memref<32x12xbf16, #tpu.memory_space<vmem>>, vector<32x12xbf16>
    %c0_1 = arith.constant 0 : index
    %c0_2 = arith.constant 0 : index
    %1 = vector.load %arg2[%c0_1, %c0_2] : memref<12x32xbf16, #tpu.memory_space<vmem>>, vector<12x32xbf16>
    %cst = arith.constant dense<0.000000e+00> : vector<32x32xf32>
    %2 = tpu.matmul %0, %1, %cst {dimension_numbers = #tpu.dot_dimension_numbers<[1], [0], [0], [1], [0, 0, 1, 1], [], []>} : vector<32x12xbf16>, vector<12x32xbf16>, vector<32x32xf32> -> vector<32x32xf32>
    %c0_3 = arith.constant 0 : index
    %c0_4 = arith.constant 0 : index
    %3 = vector.load %arg3[%c0_3, %c0_4] : memref<1x32xbf16, #tpu.memory_space<vmem>>, vector<1x32xbf16>
    %4 = arith.extf %3 : vector<1x32xbf16> to vector<1x32xf32>
    %5 = vector.broadcast %4 : vector<1x32xf32> to vector<32x32xf32>
    %6 = arith.addf %2, %5 : vector<32x32xf32>
    %7 = arith.mulf %6, %6 : vector<32x32xf32>
    %cst_5 = arith.constant dense<0.000000e+00> : vector<32xf32>
    %8 = vector.multi_reduction <add>, %7, %cst_5 [1] : vector<32x32xf32> to vector<32xf32>
    %9 = vector.shape_cast %8 : vector<32xf32> to vector<32x1xf32>
    %cst_6 = arith.constant 3.200000e+01 : f32
    %10 = vector.broadcast %cst_6 : f32 to vector<32x1xf32>
    %11 = arith.divf %9, %10 : vector<32x1xf32>
    %12 = math.rsqrt %11 : vector<32x1xf32>
    %13 = vector.broadcast %12 : vector<32x1xf32> to vector<32x32xf32>
    %14 = arith.mulf %6, %13 : vector<32x32xf32>
    %15 = arith.truncf %14 : vector<32x32xf32> to vector<32x32xbf16>
    %c0_7 = arith.constant 0 : index
    %c0_8 = arith.constant 0 : index
    %16 = vector.load %arg4[%c0_7, %c0_8] : memref<32x32xbf16, #tpu.memory_space<vmem>>, vector<32x32xbf16>
    tpu.vector_store %arg4[%c0_7, %c0_8], %15 {strides = array<i32>} : memref<32x32xbf16, #tpu.memory_space<vmem>>, vector<32x32xbf16>,
    return
  }
  func.func @transform_0(%arg0: i32) -> (i32, i32) {
    %c0_i32 = arith.constant 0 : i32
    %c0_i32_0 = arith.constant 0 : i32
    return %arg0, %c0_i32 : i32, i32
  }
  func.func @transform_1(%arg0: i32) -> (i32, i32) {
    %c0_i32 = arith.constant 0 : i32
    %c0_i32_0 = arith.constant 0 : i32
    %c0_i32_1 = arith.constant 0 : i32
    return %c0_i32, %c0_i32_0 : i32, i32
  }
  func.func @transform_2(%arg0: i32) -> (i32, i32) {
    %c0_i32 = arith.constant 0 : i32
    %c0_i32_0 = arith.constant 0 : i32
    %c0_i32_1 = arith.constant 0 : i32
    return %c0_i32, %c0_i32_0 : i32, i32
  }
  func.func @transform_3(%arg0: i32) -> (i32, i32) {
    %c0_i32 = arith.constant 0 : i32
    %c0_i32_0 = arith.constant 0 : i32
    return %arg0, %c0_i32 : i32, i32
  }
}

</mosaic_0001>

<bundles_post_ra>
// kernel: tpu_custom_call.1
= control target key start
LH: loop header
LB: loop body
LE: loop exit
PB: predicated region body
PF: predicated region fallthrough
CT: control target
= control target key end

     0   :  { %8 = vsyncpa [#allocation3], 0  ;;  %s736_s0 = inlined_call_operand.hbm [shape: f32[16,128], index: 0, kind: input, shape index: {}]   ;;  %s737_s1 = inlined_call_operand.hbm [shape: f32[8,128], index: 1, kind: input, shape index: {}]   ;;  %s738_s2 = inlined_call_operand.hbm [shape: f32[2,8,128], index: 2, kind: input, shape index: {}]   ;;  %s739_s3 = inlined_call_operand.hbm [shape: f32[16,128], index: 3, kind: output, shape index: {}]  }
   0x1   :  { %9 = vsyncpa [#allocation6], 0 }
   0x2   :  { %10 = vsyncpa [#allocation4], 0 }
   0x3   :  { %12 = vsyncpa [#allocation4 + $0x1], 0  ;;  %s574_s12 = smov 0   ;;  %s576_s13 = smov 0  }
   0x4   :  { %s578_s14 = smov 0   ;;  %s580_s15 = smov 0  }
   0x5 LB: > { %s148_s18 = sshll.u32 %s737_s1, 4  ;;  %s598_s19 = sadd.s32 4294967295, %s549_s15   ;;  %s549_s15 = sphi %s580_s15, %s751_s15   ;;  %s545_s14 = sphi %s578_s14, %s750_s14   ;;  %s541_s13 = sphi %s576_s13, %s749_s13   ;;  %s537_s12 = sphi %s574_s12, %s748_s12   ;;  %s149_s18 = int_to_ptr.hbm [resolvable:$true] %s148_s18 }
   0x6   : > { %p312_p0 = scmp.ge.s32.totalorder %s549_s15, 1  ;;  %p740_p1 = scmp.eq.s32.totalorder %s598_s19, 0 }
   0x7   : > { %p122_p2 = scmp.lt.s32.totalorder %s549_s15, 3  ;;  %s551_s21 = smov [#allocation5]  }
   0x8   : > { %s150_s22 = sshll.u32 %s551_s21, 4  ;;  %s311_s23 = sadd.s32 4294967294, %s549_s15   ;;  %s151_s22 = int_to_ptr.vmem [resolvable:$true] %s150_s22 }
   0x9   : > { %p603_p3 = pnand %p312_p0, %p122_p2  ;;  %s616_s24 = sadd.s32 1, %s549_s15  }
   0xa   : > { %s22_s25 = ssub.s32 %s549_s15, %s616_s24  ;;  %s25_s26 = sadd.s32 1, %s545_s14 }
   0xb   : > { %p333_p4 = pneg %p603_p3  ;;  %p23_p6 = scmp.eq.s32.totalorder %s22_s25, 0 }
   0xc   : > { %p38_p7 = scmp.ne.s32.totalorder %s541_s13, %s537_s12  ;;  %p108_p8 = scmp.ne.s32.totalorder %s545_s14, %s541_s13 }
   0xd   : > { %p337_p5 = pnand %p333_p4, %p740_p1  ;;  %p109_p9 = scmp.eq.s32.totalorder %s598_s19, 1 }
   0xe   : > { %s627_s27 = scalar_select %p23_p6, %s545_s14, %s25_s26  }
   0xf   : > { %339 = dma.hbm_to_vmem [thread:$0]  (!%p337_p5), %s149_s18, 128, %s151_s22, [#allocation6]  }
  0x10   : > { %p631_p10 = por %p740_p1, %p38_p7  ;;  %p635_p11 = por %p109_p9, %p108_p8 }
  0x11   : > { %p115_p12 = scmp.eq.s32.totalorder %s311_s23, 1  ;;  %s640_s30 = sshll.u32 %s598_s19, 3 }
  0x12   : > { %s134_s6 = scalar_lea.hbm %s736_s0, %s640_s30  ;;  %s552_s9 = smov [#allocation2]  }
  0x13   : > { %p646_p13 = por %p115_p12, %p38_p7  ;;  %s136_s8 = sshll.u32 %s134_s6, 4  ;;  %s137_s8 = int_to_ptr.hbm [resolvable:$true] %s136_s8 }
  0x14   : > { %s138_s10 = sshll.u32 %s552_s9, 4  ;;  %p655_p0 = pnand %p333_p4, %p631_p10  ;;  %s139_s10 = int_to_ptr.vmem [resolvable:$true] %s138_s10 }
  0x15   : > { %s160_s18 = scalar_lea.hbm %s738_s2, %s640_s30  ;;  %s415_s22 = sshra.s32 %s137_s8, 4  ;;  %s416_s22 = int_to_ptr.hbm [resolvable:$true] %s415_s22 }
  0x16   : > { %s663_s21 = sshll.u32 %s160_s18, 4  ;;  %s417_s23 = scalar_lea.hbm %s416_s22, 8  ;;  %s163_s21 = int_to_ptr.hbm [resolvable:$true] %s663_s21 }
  0x17   : > { %p418_p2 = scmp.ne.s32.totalorder %s416_s22, %s417_s23  ;;  %p419_p5 = pneg %p655_p0 }
  0x18   : > { %s422_s4 = scalar_lea.hbm %s736_s0, 16  ;;  %p423_p7 = scmp.lt.s32.totalorder %s416_s22, %s736_s0 }
  0x19   : > { %p420_p4 = pnand %p419_p5, %p418_p2  ;;  %p424_p8 = scmp.lt.s32.totalorder %s422_s4, %s417_s23 }
  0x1b   : > { %p421_p6 = pneg %p420_p4  ;;  %p425_p9 = por %p424_p8, %p423_p7 }
  0x1d   : > { %p426_p12 = pnand %p425_p9, %p421_p6 }
  0x1f   : > { %429 = shalt.err (!%p426_p12)
}
  0x20   : > { %336 = dma.hbm_to_vmem [thread:$0]  (!%p655_p0), %s137_s8, 128, %s139_s10, [#allocation3]  }
  0x21   : > { %s553_s9 = smov [#allocation7]   ;;  %s445_s17 = sshra.s32 %s163_s21, 4  ;;  %s446_s17 = int_to_ptr.hbm [resolvable:$true] %s445_s17 }
  0x22   : > { %s164_s16 = sshll.u32 %s553_s9, 4  ;;  %s447_s18 = scalar_lea.hbm %s446_s17, 8  ;;  %s165_s16 = int_to_ptr.vmem [resolvable:$true] %s164_s16 }
  0x23   : > { %p448_p2 = scmp.ne.s32.totalorder %s446_s17, %s447_s18  ;;  %s452_s25 = scalar_lea.hbm %s738_s2, 16 }
  0x24   : > { %p453_p6 = scmp.lt.s32.totalorder %s446_s17, %s738_s2  ;;  %p454_p7 = scmp.lt.s32.totalorder %s452_s25, %s447_s18 }
  0x25   : > { %p450_p4 = pnand %p448_p2, %p419_p5 }
  0x26   : > { %p455_p8 = por %p454_p7, %p453_p6 }
  0x27   : > { %p451_p1 = pneg %p450_p4 }
  0x29   : > { %p456_p9 = pnand %p455_p8, %p451_p1 }
  0x2b   : > { %459 = shalt.err (!%p456_p9)
}
  0x2c   : > { %342 = dma.hbm_to_vmem [thread:$0]  (!%p655_p0), %s163_s21, 128, %s165_s16, [#allocation6]  }
  0x2d   : > { %177 = sbr.rel (%p603_p3) target bundleno = 72 (0x48), region = 32 }
  0x32   : > { %520 = dma.done.wait (%p631_p10), [#allocation3], 128  }
  0x33   : > { %522 = vsyncadd (%p631_p10), [#allocation3], 4294967168  ;;  %p746_p5 = scmp.eq.s32.totalorder %s598_s19, 0 }
  0x35   : > { %524 = dma.done.wait (%p746_p5), [#allocation6], 128   ;;  %p747_p12 = pmov %p746_p5 }
  0x37   : > { %526 = vsyncadd (%p747_p12), [#allocation6], 4294967168 }
  0x38   : > { %528 = dma.done.wait (%p631_p10), [#allocation6], 128  }
  0x39   : > { %530 = vsyncadd (%p631_p10), [#allocation6], 4294967168  ;;  %s204_s20 = sand.u32 1, %s541_s13   ;;  %s224_s21 = scalar_lea.hbm %s739_s3, %s640_s30  ;;  %v207_v0 = vld [vmem:[#allocation2] sm:$0xff]  ;;  %v208_v1 = vld [vmem:[#allocation5] sm:$0xff] }
  0x3a   : > { %s318_s8 = sshll.u32 %s204_s20, 3  ;;  %v210_v2 = vld [vmem:[#allocation7] sm:$0xff]  ;;  %s228_s6 = sshll.u32 %s224_s21, 4  ;;  %v209_v3 = vadd.f32 %v208_v1, %v207_v0  ;;  %s229_s6 = int_to_ptr.hbm [resolvable:$true] %s228_s6 }
  0x3b   : > { %s206_s19 = scalar_lea.vmem [#allocation8], %s318_s8  ;;  %s214_s28 = scalar_lea.sflag [#allocation4], %s204_s20 }
  0x3c   : > { %s226_s5 = sshll.u32 %s206_s19, 4  ;;  %v211_v4 = vadd.f32 %v210_v2, %v209_v3  ;;  %s489_s9 = sshra.s32 %s229_s6, 4  ;;  %s227_s5 = int_to_ptr.vmem [resolvable:$true] %s226_s5  ;;  %s490_s9 = int_to_ptr.hbm [resolvable:$true] %s489_s9 }
  0x3d   : > { %s491_s16 = scalar_lea.hbm %s490_s9, 8  ;;  %s495_s18 = scalar_lea.hbm %s739_s3, 16 }
  0x3e   : > { %212 = vst [vmem:[%s206_s19] sm:$0xff] %v211_v4  ;;  %p492_p1 = scmp.ne.s32.totalorder %s490_s9, %s491_s16  ;;  %p496_p0 = scmp.lt.s32.totalorder %s490_s9, %s739_s3 }
  0x3f   : > { %p497_p2 = scmp.lt.s32.totalorder %s495_s18, %s491_s16 }
  0x40   : > { %p493_p3 = pnand %p492_p1, %p635_p11 }
  0x41   : > { %p498_p4 = por %p497_p2, %p496_p0 }
  0x42   : > { %p494_p10 = pneg %p493_p3 }
  0x44   : > { %p499_p6 = pnand %p498_p4, %p494_p10 }
  0x46   : > { %502 = shalt.err (!%p499_p6)
}
  0x47   : > { %331 = dma.vmem_to_hbm [thread:$0]  (%p635_p11), %s227_s5, 128, %s229_s6, %s214_s28  }
  0x48 PF: > { %p349_p7 = scmp.ge.s32.totalorder %s549_s15, 2  ;;  %s240_s25 = sand.u32 1, %s537_s12  }
  0x49   : > { %s241_s26 = scalar_lea.sflag [#allocation4], %s240_s25 }
  0x4a   : > { %p344_p8 = pnand %p349_p7, %p646_p13 }
  0x4c   : > { %p345_p9 = pneg %p344_p8 }
  0x4e   : > { %532 = dma.done.wait (%p345_p9), %s241_s26, 128  }
  0x4f   : > { %534 = vsyncadd (%p345_p9), %s241_s26, 4294967168  ;;  %p15_p5 = scmp.ge.s32.totalorder %s616_s24, 4   ;;  %s748_s12 = smov %s541_s13 }
  0x50   : > { %s749_s13 = smov %s545_s14  ;;  %s750_s14 = smov %s627_s27 }
  0x51   : > { %s751_s15 = smov %s616_s24  ;;  %17 = sbr.rel (!%p15_p5) target bundleno = 5 (0x5), region = 79 }
  0x56   :  { %247 = vsyncpa [#allocation3], 1 }
  0x57   :  { %249 = vsyncpa [#allocation3 + $0x1], 1 }
  0x58   :  { %250 = vsyncpa [#allocation6], 1 }
  0x59   :  { %251 = vsyncpa [#allocation4], 1 }
  0x5a   :  { %253 = vsyncpa [#allocation4 + $0x1], 1 }

// kernel: tpu_custom_call.1
= control target key start
LH: loop header
LB: loop body
LE: loop exit
PB: predicated region body
PF: predicated region fallthrough
CT: control target
= control target key end

     0   :  { %vm47_vm0 = vcmask 1045504   ;;  %s293_s0 = inlined_call_operand.vmem [shape: bf16[32,12], index: 0, kind: input, shape index: {}]   ;;  %s294_s1 = inlined_call_operand.vmem [shape: bf16[12,32], index: 1, kind: input, shape index: {}]   ;;  %s295_s2 = inlined_call_operand.vmem [shape: bf16[1,32], index: 2, kind: input, shape index: {}]   ;;  %s296_s3 = inlined_call_operand.hbm [shape: bf16[32,32], index: 3, kind: output, shape index: {}]  }
   0x1   :  { %v179_v0 = vld [vmem:[%s294_s1] sm:$0xf]  ;;  %v185_v1 = vld [vmem:[%s294_s1] sm:$0x30] }
   0x2   :  { %v180_v2 = vor.u32 %v185_v1, %v179_v0 }
   0x3   :  { %8 = vsyncpa [#allocation3], 0  ;;  %v183_v4 = vld [vmem:[%s293_s0] sm:$0xff]  ;;  %v184_v5 = vld [vmem:[%s293_s0 + $0x8] sm:$0xff]  ;;  %vm40_vm1 = vcmask 97280   ;;  %vm74_vm2 = vcmask 261120  }
   0x4   :  { %v49_v3 = vsel %vm47_vm0, %v180_v2, 0  ;;  %v22_v6 = vld [vmem:[%s295_s2] sm:$0x1]  ;;  %v227_v25 = vmov 32.0   ;;  %vm146_vm10 = vcmask 257024   ;;  %s228_s0 = smov [#allocation2]  }
   0x5   :  { %58 = vmatpush.bf16.msra.mxu0 %v49_v3  ;;  %186 = vmatpush.bf16.msra.mxu1 %v49_v3  ;;  %v23_v7 = vunpack.c.l.bf16 %v22_v6  ;;  %191 = vrcp.f32 %v227_v25  ;;  %s155_s1 = sshll.u32 %s228_s0, 4  ;;  %s157_s23 = sshll.u32 %s296_s3, 4  ;;  %s156_s1 = int_to_ptr.vmem [resolvable:$true] %s155_s1  ;;  %s158_s23 = int_to_ptr.hbm [resolvable:$true] %s157_s23 }
   0x6   :  { %s229_s24 = smov 64   ;;  %s230_s25 = smov 4  }
   0x7   :  { %v24_v8 = vperm.slane %v23_v7, 0 }
   0x8   :  { %181 = vmatmul.msk.bf16.vlgmr.msra.gmra.mxu0 %vm40_vm1, %v183_v4  ;;  %182 = vmatmul.msk.bf16.vlgmr.msra.gmra.mxu1 %vm40_vm1, %v184_v5 }
   0xb   :  { %v192_v26 = vpop.eup %191 }
   0xc   :  { %v88_v27 = vmul.f32 32.0, %v192_v26  ;;  %vm92_vm3 = vweird.f32 %v192_v26 }
   0xe   :  { %v89_v28 = vsub.f32 1.0, %v88_v27 }
  0x10   :  { %v90_v29 = vmul.f32 %v192_v26, %v89_v28 }
  0x12   :  { %v91_v30 = vadd.f32 %v192_v26, %v90_v29 }
  0x14   :  { %v93_v31 = vsel %vm92_vm3, %v192_v26, %v91_v30 }
  0x85   :  { %v60_v9 = vpop.f32.mrf.mxu0  ;;  %v65_v10 = vpop.f32.mrf.mxu1 }
  0x86   :  { %v266_v11 = vadd.f32 %v60_v9, %v24_v8  ;;  %v268_v12 = vadd.f32 %v65_v10, %v24_v8 }
  0x88   :  { %v72_v13 = vmul.f32 %v268_v12, %v268_v12  ;;  %v70_v14 = vmul.f32 %v266_v11, %v266_v11 }
  0x8a   :  { %v81_v15 = vsel %vm74_vm2, %v72_v13, 0.0  ;;  %v75_v16 = vsel %vm74_vm2, %v70_v14, 0.0 }
  0x8b   :  { %82 = vadd.xlane.f32.xlu1 %v81_v15  ;;  %76 = vadd.xlane.f32.xlu0 %v75_v16 }
  0x8d   :  { %v62_v17 = vpop.f32.mrf.mxu0  ;;  %v67_v18 = vpop.f32.mrf.mxu1 }
  0x8e   :  { %v274_v19 = vadd.f32 %v62_v17, %v24_v8  ;;  %v276_v20 = vadd.f32 %v67_v18, %v24_v8 }
  0x90   :  { %v73_v21 = vmul.f32 %v276_v20, %v276_v20  ;;  %v71_v22 = vmul.f32 %v274_v19, %v274_v19 }
  0x92   :  { %v84_v23 = vsel %vm74_vm2, %v73_v21, 0.0  ;;  %v78_v24 = vsel %vm74_vm2, %v71_v22, 0.0 }
  0x93   :  { %85 = vadd.xlane.f32.xlu1 %v84_v23  ;;  %79 = vadd.xlane.f32.xlu0 %v78_v24 }
  0xfe   :  { %v83_v32 = vpop.xlane.xlu1 %82  ;;  %v77_v33 = vpop.xlane.xlu0 %76 }
  0xff   :  { %v96_v34 = vmul.f32 %v93_v31, %v83_v32  ;;  %v94_v35 = vmul.f32 %v93_v31, %v77_v33 }
 0x101   :  { %193 = vrsqrt.f32 %v96_v34  ;;  %vm124_vm6 = vweird.f32 %v96_v34  ;;  %vm104_vm8 = vweird.f32 %v94_v35 }
 0x102   :  { %195 = vrsqrt.f32 %v94_v35 }
 0x106   :  { %v86_v36 = vpop.xlane.xlu1 %85  ;;  %v80_v37 = vpop.xlane.xlu0 %79 }
 0x107   :  { %v194_v38 = vpop.eup %193  ;;  %v97_v39 = vmul.f32 %v93_v31, %v86_v36  ;;  %v95_v40 = vmul.f32 %v93_v31, %v80_v37 }
 0x108   :  { %v196_v41 = vpop.eup %195  ;;  %v119_v42 = vmul.f32 %v194_v38, %v96_v34  ;;  %vm125_vm4 = vweird.f32 %v194_v38 }
 0x109   :  { %v99_v43 = vmul.f32 %v196_v41, %v94_v35  ;;  %197 = vrsqrt.f32 %v97_v39  ;;  %vm105_vm5 = vweird.f32 %v196_v41  ;;  %vm126_vm7 = vmor %vm124_vm6, %vm125_vm4  ;;  %vm134_vm13 = vweird.f32 %v97_v39 }
 0x10a   :  { %v120_v44 = vmul.f32 %v194_v38, %v119_v42  ;;  %199 = vrsqrt.f32 %v95_v40  ;;  %vm106_vm9 = vmor %vm104_vm8, %vm105_vm5  ;;  %vm114_vm15 = vweird.f32 %v95_v40 }
 0x10b   :  { %v100_v45 = vmul.f32 %v196_v41, %v99_v43 }
 0x10c   :  { %v121_v46 = vmul.f32 0.5, %v120_v44 }
 0x10d   :  { %v101_v47 = vmul.f32 0.5, %v100_v45 }
 0x10e   :  { %v122_v48 = vsub.f32 1.5, %v121_v46 }
 0x10f   :  { %v198_v49 = vpop.eup %197  ;;  %v102_v50 = vsub.f32 1.5, %v101_v47 }
 0x110   :  { %v200_v51 = vpop.eup %199  ;;  %v123_v52 = vmul.f32 %v194_v38, %v122_v48  ;;  %v129_v53 = vmul.f32 %v198_v49, %v97_v39  ;;  %vm135_vm11 = vweird.f32 %v198_v49 }
 0x111   :  { %v103_v54 = vmul.f32 %v196_v41, %v102_v50  ;;  %v109_v55 = vmul.f32 %v200_v51, %v95_v40  ;;  %vm115_vm12 = vweird.f32 %v200_v51  ;;  %vm136_vm14 = vmor %vm134_vm13, %vm135_vm11 }
 0x112   :  { %v127_v56 = vsel %vm126_vm7, %v194_v38, %v123_v52  ;;  %v130_v57 = vmul.f32 %v198_v49, %v129_v53  ;;  %vm116_vm0 = vmor %vm114_vm15, %vm115_vm12 }
 0x113   :  { %v140_v58 = vmul.f32 %v127_v56, %v268_v12  ;;  %v107_v59 = vsel %vm106_vm9, %v196_v41, %v103_v54  ;;  %v110_v60 = vmul.f32 %v200_v51, %v109_v55 }
 0x114   :  { %v138_v61 = vmul.f32 %v107_v59, %v266_v11  ;;  %v131_v62 = vmul.f32 0.5, %v130_v57 }
 0x115   :  { %v144_v63 = vpack.c.bf16 %v140_v58, %v140_v58  ;;  %v111_v0 = vmul.f32 0.5, %v110_v60 }
 0x116   :  { %v142_v1 = vpack.c.bf16 %v138_v61, %v138_v61  ;;  %v132_v2 = vsub.f32 1.5, %v131_v62 }
 0x117   :  { %149 = vst.msk [vmem:[#allocation2 + $0x8] sm:$0xf] %vm146_vm10, %v144_v63  ;;  %v112_v3 = vsub.f32 1.5, %v111_v0 }
 0x118   :  { %147 = vst.msk [vmem:[#allocation2] sm:$0xf] %vm146_vm10, %v142_v1  ;;  %v133_v4 = vmul.f32 %v198_v49, %v132_v2 }
 0x119   :  { %v113_v5 = vmul.f32 %v200_v51, %v112_v3 }
 0x11a   :  { %v137_v6 = vsel %vm136_vm14, %v198_v49, %v133_v4 }
 0x11b   :  { %v141_v7 = vmul.f32 %v137_v6, %v276_v20  ;;  %v117_v8 = vsel %vm116_vm0, %v200_v51, %v113_v5 }
 0x11c   :  { %v139_v9 = vmul.f32 %v117_v8, %v274_v19 }
 0x11d   :  { %v145_v10 = vpack.c.bf16 %v141_v7, %v141_v7 }
 0x11e   :  { %v143_v11 = vpack.c.bf16 %v139_v9, %v139_v9 }
 0x11f   :  { %150 = vst.msk [vmem:[#allocation2 + $0xc] sm:$0xf] %vm146_vm10, %v145_v10 }
 0x120   :  { %148 = vst.msk [vmem:[#allocation2 + $0x4] sm:$0xf] %vm146_vm10, %v143_v11 }
 0x121   :  { %163 = dma.vmem_to_hbm [thread:$0]  %s156_s1, 256, %s158_s23, [#allocation3], %s229_s24, %s229_s24, %s230_s25  }
 0x122   :  { %225 = dma.done.wait [#allocation3], 256  }
 0x123   :  { %226 = vsyncadd [#allocation3], 4294967040 }
 0x124   :  { %168 = vsyncpa [#allocation3], 1 }

</bundles_post_ra>
